<compile_context>
chip_gen: v6e
topology: v6e:2x2x1
jax: 0.10.0
libtpu: 0.0.40
codegen_flags: <defaults>
</compile_context>

<pallas_src>
import jax
import jax.numpy as jnp
from jax.experimental import pallas as pl
from jax.experimental.pallas import tpu as pltpu


def _pick_tile(total: int, preferred: int, alignments=(256, 128, 8)) -> int:
    """Largest tile <= preferred that divides `total`, trying coarse-to-fine
    alignments (256 -> 128 -> 8); falls back to the full extent (always a
    legal BlockSpec)."""
    if total <= preferred:
        return total
    for align in alignments:
        t = (preferred // align) * align
        while t >= align:
            if total % t == 0:
                return t
            t -= align
    return total


def _vmem_limit(est_bytes: int) -> int:
    """Clamp the requested VMEM budget to the device's physical capacity."""
    try:
        cap = int(pltpu.get_tpu_info().vmem_capacity_bytes)
    except Exception:
        cap = 64 * 1024 * 1024      # conservative: v7x physical VMEM per TC
    hi = cap - (4 << 20)            # headroom for Mosaic internal scratch
    lo = 32 << 20
    want = int(1.25 * est_bytes)
    return int(max(min(max(want, lo), hi), 16 << 20))


def _sigmoid_fast(r):
    # sigmoid(r) = 1 / (1 + exp(-r)); approx reciprocal goes to the EUP slot
    # so the epilogue overlaps the last Wv matmul.
    return pl.reciprocal(1.0 + jnp.exp(-r), approx=True)


def _cmix_fused_kernel(x_ref, xprev_ref, maa_k_ref, maa_r_ref, wr_ref,
                       wk_ref, wv_ref, out_ref, xk_scr, r_scr, kv_acc):
    """grid = (row_tiles, F_tiles); F axis must stay last (scratch carry)."""
    f = pl.program_id(1)

    @pl.when(f == 0)
    def _init():
        x = x_ref[...].astype(jnp.float32)
        xx = xprev_ref[...].astype(jnp.float32) - x          # time_shift(x) - x
        xk = x + xx * maa_k_ref[...]                         # (1, C) broadcasts
        xr = x + xx * maa_r_ref[...]
        xk_scr[...] = xk.astype(jnp.bfloat16)                # reused per F tile
        r_scr[...] = jnp.dot(xr.astype(jnp.bfloat16), wr_ref[...],
                             preferred_element_type=jnp.float32)
        kv_acc[...] = jnp.zeros_like(kv_acc)

    # Streamed FFN tile:  k = relu(xk @ Wk[:, f0:f0+tf])^2  (square + acc in f32)
    k = jnp.dot(xk_scr[...], wk_ref[...], preferred_element_type=jnp.float32)
    k = jnp.maximum(k, 0.0)
    k = k * k
    kv_acc[...] += jnp.dot(k.astype(jnp.bfloat16), wv_ref[...],
                           preferred_element_type=jnp.float32)

    @pl.when(f == pl.num_programs(1) - 1)
    def _finalize():
        out_ref[...] = (_sigmoid_fast(r_scr[...]) * kv_acc[...]).astype(out_ref.dtype)


def _cmix_hoisted_kernel(xk_ref, r_ref, wk_ref, wv_ref, out_ref, kv_acc):
    """Variant with the time-mix and receptance matmul hoisted to the wrapper."""
    f = pl.program_id(1)

    @pl.when(f == 0)
    def _init():
        kv_acc[...] = jnp.zeros_like(kv_acc)

    k = jnp.dot(xk_ref[...], wk_ref[...], preferred_element_type=jnp.float32)
    k = jnp.maximum(k, 0.0)
    k = k * k
    kv_acc[...] += jnp.dot(k.astype(jnp.bfloat16), wv_ref[...],
                           preferred_element_type=jnp.float32)

    @pl.when(f == pl.num_programs(1) - 1)
    def _finalize():
        out_ref[...] = (_sigmoid_fast(r_ref[...]) * kv_acc[...]).astype(out_ref.dtype)


def rwkv_cmix_x060(x, time_maa_k, time_maa_r, w_key, w_receptance, w_value,
                   *, row_tile=512, f_tile=256, hoist_receptance=None):
    """x: (B, T, C).  Linear weights pre-transposed to (in, out)."""
    B, T, C = x.shape
    F = w_key.shape[1]
    assert w_key.shape == (C, F)
    assert w_receptance.shape == (C, C)
    assert w_value.shape == (F, C)

    if hoist_receptance is None:
        # At large C a resident C x C Wr dominates VMEM (and the f==0 step is a
        # pipeline bubble): hoist the receptance matmul to plain XLA there.
        hoist_receptance = C >= 2048

    wk = w_key.astype(jnp.bfloat16)
    wv = w_value.astype(jnp.bfloat16)
    wr = w_receptance.astype(jnp.bfloat16)
    maa_k = time_maa_k.reshape(1, C).astype(jnp.float32)
    maa_r = time_maa_r.reshape(1, C).astype(jnp.float32)

    # time_shift == nn.ZeroPad2d((0,0,1,-1)): shifted[:, t] = x[:, t-1], row 0 = 0.
    # bf16 activations halve activation DMA + VMEM; the mix math stays f32.
    xb = x.astype(jnp.bfloat16)
    x_prev = jnp.concatenate([jnp.zeros_like(xb[:, :1]), xb[:, :-1]], axis=1)

    rows = B * T
    out_dtype = x.dtype
    out_b = jnp.dtype(out_dtype).itemsize

    tm = _pick_tile(rows, row_tile, (256, 128, 8))   # MXU M dim / weight reuse
    tf = _pick_tile(F, f_tile, (256, 128, 8))        # streamed FFN tile
    grid = (rows // tm, F // tf)

    if not hoist_receptance:
        x2 = xb.reshape(rows, C)
        xp2 = x_prev.reshape(rows, C)

        est = (2 * 2 * tm * C * 2          # x + x_prev bf16 tiles (double-buffered)
               + 2 * 2 * C * 4             # maa_k, maa_r
               + 2 * C * C * 2             # Wr (constant index)
               + 2 * C * tf * 2            # Wk column tile
               + 2 * tf * C * 2            # Wv row tile
               + 2 * tm * C * out_b        # out tile
               + tm * C * (2 + 4 + 4)      # xk(bf16) + r(f32) + kv(f32) scratch
               + tm * tf * 4)              # relu^2 intermediate
        vmem_limit = _vmem_limit(est)

        cost = pl.CostEstimate(
            flops=2 * rows * (2 * C * F + C * C),
            transcendentals=2 * rows * C,                        # exp + reciprocal
            bytes_accessed=((x2.size + xp2.size) * 2 + rows * C * out_b
                            + (wk.size + wv.size + wr.size) * 2 * (rows // tm)),
        )

        out2 = pl.pallas_call(
            _cmix_fused_kernel,
            out_shape=jax.ShapeDtypeStruct((rows, C), out_dtype),
            grid_spec=pltpu.PrefetchScalarGridSpec(
                num_scalar_prefetch=0,
                grid=grid,
                in_specs=[
                    pl.BlockSpec((tm, C), lambda i, f: (i, 0)),    # x rows (bf16)
                    pl.BlockSpec((tm, C), lambda i, f: (i, 0)),    # shifted rows
                    pl.BlockSpec((1, C), lambda i, f: (0, 0)),     # time_maa_k
                    pl.BlockSpec((1, C), lambda i, f: (0, 0)),     # time_maa_r
                    pl.BlockSpec((C, C), lambda i, f: (0, 0)),     # Wr (resident)
                    pl.BlockSpec((C, tf), lambda i, f: (0, f)),    # Wk (streamed)
                    pl.BlockSpec((tf, C), lambda i, f: (f, 0)),    # Wv (streamed)
                ],
                out_specs=pl.BlockSpec((tm, C), lambda i, f: (i, 0)),
                scratch_shapes=[
                    pltpu.VMEM((tm, C), jnp.bfloat16),   # xk
                    pltpu.VMEM((tm, C), jnp.float32),    # r = xr @ Wr
                    pltpu.VMEM((tm, C), jnp.float32),    # kv accumulator
                ],
            ),
            compiler_params=pltpu.CompilerParams(
                dimension_semantics=("parallel", "arbitrary"),
                vmem_limit_bytes=vmem_limit,
            ),
            cost_estimate=cost,
        )(x2, xp2, maa_k, maa_r, wr, wk, wv)

    else:
        # Hoisted path: time-mix + receptance matmul as plain XLA ops (f32
        # accumulation, bf16 MXU operands -- same numerics as the fused path).
        xf = xb.astype(jnp.float32)
        xx = x_prev.astype(jnp.float32) - xf
        xk = (xf + xx * maa_k.reshape(1, 1, C)).astype(jnp.bfloat16)
        xr = (xf + xx * maa_r.reshape(1, 1, C)).astype(jnp.bfloat16)
        r = jnp.einsum("btc,cd->btd", xr, wr, preferred_element_type=jnp.float32)
        xk2 = xk.reshape(rows, C)
        r2 = r.reshape(rows, C)

        est = (2 * tm * C * 2              # xk bf16 tile (double-buffered)
               + 2 * tm * C * 4            # r f32 tile
               + 2 * C * tf * 2            # Wk column tile
               + 2 * tf * C * 2            # Wv row tile
               + 2 * tm * C * out_b        # out tile
               + tm * C * 4                # kv accumulator scratch
               + tm * tf * 4)              # relu^2 intermediate
        vmem_limit = _vmem_limit(est)

        cost = pl.CostEstimate(
            flops=2 * rows * 2 * C * F,
            transcendentals=2 * rows * C,
            bytes_accessed=(xk2.size * 2 + r2.size * 4 + rows * C * out_b
                            + (wk.size + wv.size) * 2 * (rows // tm)),
        )

        out2 = pl.pallas_call(
            _cmix_hoisted_kernel,
            out_shape=jax.ShapeDtypeStruct((rows, C), out_dtype),
            grid_spec=pltpu.PrefetchScalarGridSpec(
                num_scalar_prefetch=0,
                grid=grid,
                in_specs=[
                    pl.BlockSpec((tm, C), lambda i, f: (i, 0)),    # xk rows (bf16)
                    pl.BlockSpec((tm, C), lambda i, f: (i, 0)),    # r rows (f32)
                    pl.BlockSpec((C, tf), lambda i, f: (0, f)),    # Wk (streamed)
                    pl.BlockSpec((tf, C), lambda i, f: (f, 0)),    # Wv (streamed)
                ],
                out_specs=pl.BlockSpec((tm, C), lambda i, f: (i, 0)),
                scratch_shapes=[
                    pltpu.VMEM((tm, C), jnp.float32),    # kv accumulator
                ],
            ),
            compiler_params=pltpu.CompilerParams(
                dimension_semantics=("parallel", "arbitrary"),
                vmem_limit_bytes=vmem_limit,
            ),
            cost_estimate=cost,
        )(xk2, r2, wk, wv)

    return out2.reshape(B, T, C)


def reference_cmix(x, time_maa_k, time_maa_r, w_key, w_receptance, w_value,
                   *, match_kernel_precision=True):
    """Pure-JAX reference matching the PyTorch forward.  With
    match_kernel_precision=True it applies the same bf16 casts the kernel uses."""
    maa_k = time_maa_k.reshape(1, 1, -1).astype(jnp.float32)
    maa_r = time_maa_r.reshape(1, 1, -1).astype(jnp.float32)
    if match_kernel_precision:
        xw = x.astype(jnp.bfloat16).astype(jnp.float32)
        op = jnp.bfloat16
    else:
        xw = x.astype(jnp.float32)
        op = jnp.float32
    shifted = jnp.concatenate([jnp.zeros_like(xw[:, :1, :]), xw[:, :-1, :]], axis=1)
    xx = shifted - xw
    xk = (xw + xx * maa_k).astype(op)
    xr = (xw + xx * maa_r).astype(op)
    wk = w_key.astype(op)
    wr = w_receptance.astype(op)
    wv = w_value.astype(op)
    k = jnp.einsum("btc,cf->btf", xk, wk, preferred_element_type=jnp.float32)
    k = jnp.maximum(k, 0.0)
    k = k * k
    kv = jnp.einsum("btf,fc->btc", k.astype(op), wv,
                    preferred_element_type=jnp.float32)
    r = jnp.einsum("btc,cd->btd", xr, wr, preferred_element_type=jnp.float32)
    return jax.nn.sigmoid(r) * kv


if __name__ == "__main__":
    # Small, module-consistent shapes.
    B, T = 2, 8
    n_embd = 32          # C
    dim_ffn = 112        # F (3.5 * n_embd, RWKV convention)
    layer_id, n_layer = 1, 24

    # Deterministic parameter init (mirrors the module's __init__ formulas).
    ratio_1_to_almost0 = 1.0 - layer_id / n_layer
    ddd = jnp.arange(n_embd, dtype=jnp.float32) / n_embd
    time_maa_k = (1.0 - jnp.power(ddd, ratio_1_to_almost0)).reshape(1, n_embd)
    time_maa_r = (1.0 - jnp.power(ddd, ratio_1_to_almost0)).reshape(1, n_embd)

    key = jax.random.PRNGKey(0)
    kx, kk, kr, kvw = jax.random.split(key, 4)
    x = jax.random.normal(kx, (B, T, n_embd), dtype=jnp.float32)
    # nn.Linear weights are (out, in); the kernel takes them transposed (in, out).
    w_key = jax.random.normal(kk, (n_embd, dim_ffn), dtype=jnp.float32) * 0.02
    w_receptance = jax.random.normal(kr, (n_embd, n_embd), dtype=jnp.float32) * 0.02
    w_value = jax.random.normal(kvw, (dim_ffn, n_embd), dtype=jnp.float32) * 0.02

    ref_match = reference_cmix(x, time_maa_k, time_maa_r, w_key, w_receptance,
                               w_value, match_kernel_precision=True)
    ref_f32 = reference_cmix(x, time_maa_k, time_maa_r, w_key, w_receptance,
                             w_value, match_kernel_precision=False)

    # Fused-receptance path (what small / medium C uses).
    out_fused = rwkv_cmix_x060(x, time_maa_k, time_maa_r, w_key, w_receptance,
                               w_value, hoist_receptance=False)
    out_fused = jax.block_until_ready(out_fused)
    assert out_fused.shape == (B, T, n_embd)
    assert jnp.allclose(out_fused, ref_match, atol=3e-4, rtol=2e-2), \
        "fused path mismatch vs precision-matched reference"
    assert jnp.allclose(out_fused, ref_f32, atol=3e-3, rtol=5e-2), \
        "fused path mismatch vs f32 reference"

    # Hoisted-receptance path (what large C uses on v7x); exercised here too.
    out_hoist = rwkv_cmix_x060(x, time_maa_k, time_maa_r, w_key, w_receptance,
                               w_value, hoist_receptance=True)
    out_hoist = jax.block_until_ready(out_hoist)
    assert out_hoist.shape == (B, T, n_embd)
    assert jnp.allclose(out_hoist, ref_match, atol=3e-4, rtol=2e-2), \
        "hoisted path mismatch vs precision-matched reference"
    assert jnp.allclose(out_hoist, ref_f32, atol=3e-3, rtol=5e-2), \
        "hoisted path mismatch vs f32 reference"

    print("KERNEL_OK")
</pallas_src>

<mosaic_0001>
module attributes {stable_mosaic.version = 11 : i64} {
  func.func @_cmix_fused_kernel(%arg0: i32, %arg1: i32, %arg2: memref<16x32xbf16, #tpu.memory_space<vmem>>, %arg3: memref<16x32xbf16, #tpu.memory_space<vmem>>, %arg4: memref<1x32xf32, #tpu.memory_space<vmem>>, %arg5: memref<1x32xf32, #tpu.memory_space<vmem>>, %arg6: memref<32x32xbf16, #tpu.memory_space<vmem>>, %arg7: memref<32x112xbf16, #tpu.memory_space<vmem>>, %arg8: memref<112x32xbf16, #tpu.memory_space<vmem>>, %arg9: memref<16x32xf32, #tpu.memory_space<vmem>>, %arg10: memref<16x32xbf16, #tpu.memory_space<vmem>>, %arg11: memref<16x32xf32, #tpu.memory_space<vmem>>, %arg12: memref<16x32xf32, #tpu.memory_space<vmem>>) attributes {dimension_semantics = [#tpu.dimension_semantics<parallel>, #tpu.dimension_semantics<arbitrary>], iteration_bounds = array<i64: 1, 1>, scalar_prefetch = 0 : i64, scratch_operands = 3 : i64, tpu.core_type = #tpu.core_type<tc>, window_params = [{transform_indices = @transform_0, window_bounds = array<i64: 16, 32>}, {transform_indices = @transform_1, window_bounds = array<i64: 16, 32>}, {pipeline_mode = #tpu.pipeline_mode<synchronous>, transform_indices = @transform_2, window_bounds = array<i64: 1, 32>}, {pipeline_mode = #tpu.pipeline_mode<synchronous>, transform_indices = @transform_3, window_bounds = array<i64: 1, 32>}, {pipeline_mode = #tpu.pipeline_mode<synchronous>, transform_indices = @transform_4, window_bounds = array<i64: 32, 32>}, {transform_indices = @transform_5, window_bounds = array<i64: 32, 112>}, {transform_indices = @transform_6, window_bounds = array<i64: 112, 32>}, {transform_indices = @transform_7, window_bounds = array<i64: 16, 32>}]} {
    %c0_i32 = arith.constant 0 : i32
    %0 = arith.cmpi eq, %arg1, %c0_i32 : i32
    %1 = arith.extui %0 : i1 to i32
    %c0_i32_0 = arith.constant 0 : i32
    %2 = arith.cmpi ne, %1, %c0_i32_0 : i32
    scf.if %2 {
      %c0_14 = arith.constant 0 : index
      %c0_15 = arith.constant 0 : index
      %18 = vector.load %arg2[%c0_14, %c0_15] : memref<16x32xbf16, #tpu.memory_space<vmem>>, vector<16x32xbf16>
      %19 = arith.extf %18 : vector<16x32xbf16> to vector<16x32xf32>
      %c0_16 = arith.constant 0 : index
      %c0_17 = arith.constant 0 : index
      %20 = vector.load %arg3[%c0_16, %c0_17] : memref<16x32xbf16, #tpu.memory_space<vmem>>, vector<16x32xbf16>
      %21 = arith.extf %20 : vector<16x32xbf16> to vector<16x32xf32>
      %22 = arith.subf %21, %19 : vector<16x32xf32>
      %c0_18 = arith.constant 0 : index
      %c0_19 = arith.constant 0 : index
      %23 = vector.load %arg4[%c0_18, %c0_19] : memref<1x32xf32, #tpu.memory_space<vmem>>, vector<1x32xf32>
      %24 = vector.broadcast %23 : vector<1x32xf32> to vector<16x32xf32>
      %25 = arith.mulf %22, %24 : vector<16x32xf32>
      %26 = arith.addf %19, %25 : vector<16x32xf32>
      %c0_20 = arith.constant 0 : index
      %c0_21 = arith.constant 0 : index
      %27 = vector.load %arg5[%c0_20, %c0_21] : memref<1x32xf32, #tpu.memory_space<vmem>>, vector<1x32xf32>
      %28 = vector.broadcast %27 : vector<1x32xf32> to vector<16x32xf32>
      %29 = arith.mulf %22, %28 : vector<16x32xf32>
      %30 = arith.addf %19, %29 : vector<16x32xf32>
      %31 = arith.truncf %26 : vector<16x32xf32> to vector<16x32xbf16>
      %c0_22 = arith.constant 0 : index
      %c0_23 = arith.constant 0 : index
      %32 = vector.load %arg10[%c0_22, %c0_23] : memref<16x32xbf16, #tpu.memory_space<vmem>>, vector<16x32xbf16>
      tpu.vector_store %arg10[%c0_22, %c0_23], %31 {strides = array<i32>} : memref<16x32xbf16, #tpu.memory_space<vmem>>, vector<16x32xbf16>,
      %33 = arith.truncf %30 : vector<16x32xf32> to vector<16x32xbf16>
      %c0_24 = arith.constant 0 : index
      %c0_25 = arith.constant 0 : index
      %34 = vector.load %arg6[%c0_24, %c0_25] : memref<32x32xbf16, #tpu.memory_space<vmem>>, vector<32x32xbf16>
      %cst_26 = arith.constant dense<0.000000e+00> : vector<16x32xf32>
      %35 = tpu.matmul %33, %34, %cst_26 {dimension_numbers = #tpu.dot_dimension_numbers<[1], [0], [0], [1], [0, 0, 1, 1], [], []>} : vector<16x32xbf16>, vector<32x32xbf16>, vector<16x32xf32> -> vector<16x32xf32>
      %c0_27 = arith.constant 0 : index
      %c0_28 = arith.constant 0 : index
      %36 = vector.load %arg11[%c0_27, %c0_28] : memref<16x32xf32, #tpu.memory_space<vmem>>, vector<16x32xf32>
      tpu.vector_store %arg11[%c0_27, %c0_28], %35 {strides = array<i32>} : memref<16x32xf32, #tpu.memory_space<vmem>>, vector<16x32xf32>,
      %cst_29 = arith.constant 0.000000e+00 : f32
      %37 = vector.broadcast %cst_29 : f32 to vector<16x32xf32>
      %c0_30 = arith.constant 0 : index
      %c0_31 = arith.constant 0 : index
      %38 = vector.load %arg12[%c0_30, %c0_31] : memref<16x32xf32, #tpu.memory_space<vmem>>, vector<16x32xf32>
      tpu.vector_store %arg12[%c0_30, %c0_31], %37 {strides = array<i32>} : memref<16x32xf32, #tpu.memory_space<vmem>>, vector<16x32xf32>,
    } else {
    }
    %c0 = arith.constant 0 : index
    %c0_1 = arith.constant 0 : index
    %3 = vector.load %arg10[%c0, %c0_1] : memref<16x32xbf16, #tpu.memory_space<vmem>>, vector<16x32xbf16>
    %c0_2 = arith.constant 0 : index
    %c0_3 = arith.constant 0 : index
    %4 = vector.load %arg7[%c0_2, %c0_3] : memref<32x112xbf16, #tpu.memory_space<vmem>>, vector<32x112xbf16>
    %cst = arith.constant dense<0.000000e+00> : vector<16x112xf32>
    %5 = tpu.matmul %3, %4, %cst {dimension_numbers = #tpu.dot_dimension_numbers<[1], [0], [0], [1], [0, 0, 1, 1], [], []>} : vector<16x32xbf16>, vector<32x112xbf16>, vector<16x112xf32> -> vector<16x112xf32>
    %cst_4 = arith.constant 0.000000e+00 : f32
    %6 = vector.broadcast %cst_4 : f32 to vector<16x112xf32>
    %7 = arith.maximumf %5, %6 : vector<16x112xf32>
    %8 = arith.mulf %7, %7 : vector<16x112xf32>
    %c0_5 = arith.constant 0 : index
    %c0_6 = arith.constant 0 : index
    %9 = vector.load %arg12[%c0_5, %c0_6] : memref<16x32xf32, #tpu.memory_space<vmem>>, vector<16x32xf32>
    %10 = arith.truncf %8 : vector<16x112xf32> to vector<16x112xbf16>
    %c0_7 = arith.constant 0 : index
    %c0_8 = arith.constant 0 : index
    %11 = vector.load %arg8[%c0_7, %c0_8] : memref<112x32xbf16, #tpu.memory_space<vmem>>, vector<112x32xbf16>
    %cst_9 = arith.constant dense<0.000000e+00> : vector<16x32xf32>
    %12 = tpu.matmul %10, %11, %cst_9 {dimension_numbers = #tpu.dot_dimension_numbers<[1], [0], [0], [1], [0, 0, 1, 1], [], []>} : vector<16x112xbf16>, vector<112x32xbf16>, vector<16x32xf32> -> vector<16x32xf32>
    %13 = arith.addf %9, %12 : vector<16x32xf32>
    %c0_10 = arith.constant 0 : index
    %c0_11 = arith.constant 0 : index
    %14 = vector.load %arg12[%c0_10, %c0_11] : memref<16x32xf32, #tpu.memory_space<vmem>>, vector<16x32xf32>
    tpu.vector_store %arg12[%c0_10, %c0_11], %13 {strides = array<i32>} : memref<16x32xf32, #tpu.memory_space<vmem>>, vector<16x32xf32>,
    %c0_i32_12 = arith.constant 0 : i32
    %15 = arith.cmpi eq, %arg1, %c0_i32_12 : i32
    %16 = arith.extui %15 : i1 to i32
    %c0_i32_13 = arith.constant 0 : i32
    %17 = arith.cmpi ne, %16, %c0_i32_13 : i32
    scf.if %17 {
      %c0_14 = arith.constant 0 : index
      %c0_15 = arith.constant 0 : index
      %18 = vector.load %arg11[%c0_14, %c0_15] : memref<16x32xf32, #tpu.memory_space<vmem>>, vector<16x32xf32>
      %cst_16 = arith.constant 0.000000e+00 : f32
      %19 = vector.broadcast %cst_16 : f32 to vector<16x32xf32>
      %20 = arith.subf %19, %18 : vector<16x32xf32>
      %21 = math.exp %20 : vector<16x32xf32>
      %cst_17 = arith.constant 1.000000e+00 : f32
      %22 = vector.broadcast %cst_17 : f32 to vector<16x32xf32>
      %23 = arith.addf %22, %21 : vector<16x32xf32>
      %24 = tpu.reciprocal %23 {approx = true} : vector<16x32xf32> -> vector<16x32xf32>
      %c0_18 = arith.constant 0 : index
      %c0_19 = arith.constant 0 : index
      %25 = vector.load %arg12[%c0_18, %c0_19] : memref<16x32xf32, #tpu.memory_space<vmem>>, vector<16x32xf32>
      %26 = arith.mulf %24, %25 : vector<16x32xf32>
      %c0_20 = arith.constant 0 : index
      %c0_21 = arith.constant 0 : index
      %27 = vector.load %arg9[%c0_20, %c0_21] : memref<16x32xf32, #tpu.memory_space<vmem>>, vector<16x32xf32>
      tpu.vector_store %arg9[%c0_20, %c0_21], %26 {strides = array<i32>} : memref<16x32xf32, #tpu.memory_space<vmem>>, vector<16x32xf32>,
    } else {
    }
    return
  }
  func.func @transform_0(%arg0: i32, %arg1: i32) -> (i32, i32) {
    %c0_i32 = arith.constant 0 : i32
    %c0_i32_0 = arith.constant 0 : i32
    return %arg0, %c0_i32 : i32, i32
  }
  func.func @transform_1(%arg0: i32, %arg1: i32) -> (i32, i32) {
    %c0_i32 = arith.constant 0 : i32
    %c0_i32_0 = arith.constant 0 : i32
    return %arg0, %c0_i32 : i32, i32
  }
  func.func @transform_2(%arg0: i32, %arg1: i32) -> (i32, i32) {
    %c0_i32 = arith.constant 0 : i32
    %c0_i32_0 = arith.constant 0 : i32
    %c0_i32_1 = arith.constant 0 : i32
    return %c0_i32, %c0_i32_0 : i32, i32
  }
  func.func @transform_3(%arg0: i32, %arg1: i32) -> (i32, i32) {
    %c0_i32 = arith.constant 0 : i32
    %c0_i32_0 = arith.constant 0 : i32
    %c0_i32_1 = arith.constant 0 : i32
    return %c0_i32, %c0_i32_0 : i32, i32
  }
  func.func @transform_4(%arg0: i32, %arg1: i32) -> (i32, i32) {
    %c0_i32 = arith.constant 0 : i32
    %c0_i32_0 = arith.constant 0 : i32
    %c0_i32_1 = arith.constant 0 : i32
    return %c0_i32, %c0_i32_0 : i32, i32
  }
  func.func @transform_5(%arg0: i32, %arg1: i32) -> (i32, i32) {
    %c0_i32 = arith.constant 0 : i32
    %c0_i32_0 = arith.constant 0 : i32
    return %c0_i32, %arg1 : i32, i32
  }
  func.func @transform_6(%arg0: i32, %arg1: i32) -> (i32, i32) {
    %c0_i32 = arith.constant 0 : i32
    %c0_i32_0 = arith.constant 0 : i32
    return %arg1, %c0_i32 : i32, i32
  }
  func.func @transform_7(%arg0: i32, %arg1: i32) -> (i32, i32) {
    %c0_i32 = arith.constant 0 : i32
    %c0_i32_0 = arith.constant 0 : i32
    return %arg0, %c0_i32 : i32, i32
  }
}

</mosaic_0001>

<bundles_post_ra>
// kernel: tpu_custom_call.1
= control target key start
LH: loop header
LB: loop body
LE: loop exit
PB: predicated region body
PF: predicated region fallthrough
CT: control target
= control target key end

     0   :  { %v482_v1 = vmov 0.0   ;;  %vm483_vm0 = vmmov 0   ;;  %vm92_vm1 = vcmask 261120   ;;  %vm72_vm2 = vcmask 257024   ;;  %s606_s0 = inlined_call_operand.vmem [shape: bf16[16,32], index: 0, kind: input, shape index: {}]   ;;  %s607_s1 = inlined_call_operand.vmem [shape: bf16[16,32], index: 1, kind: input, shape index: {}]   ;;  %s608_s2 = inlined_call_operand.vmem [shape: f32[1,32], index: 2, kind: input, shape index: {}]   ;;  %s609_s3 = inlined_call_operand.vmem [shape: f32[1,32], index: 3, kind: input, shape index: {}]   ;;  %s610_s4 = inlined_call_operand.vmem [shape: bf16[32,32], index: 4, kind: input, shape index: {}]   ;;  %s611_s5 = inlined_call_operand.vmem [shape: bf16[32,112], index: 5, kind: input, shape index: {}]   ;;  %s612_s6 = inlined_call_operand.vmem [shape: bf16[112,32], index: 6, kind: input, shape index: {}]   ;;  %s613_s7 = inlined_call_operand.hbm [shape: f32[16,32], index: 7, kind: output, shape index: {}]  }
   0x1   :  { %v440_v0 = vld [vmem:[%s610_s4 + $0x8] sm:$0xff]   ;;  %401 = vmatprep.subr.bf16.mxu1 %v482_v1  ;;  %417 = vmatprep.subr.bf16.mxu0 %v482_v1  ;;  %v441_v2 = vld [vmem:[%s610_s4] sm:$0xff]   ;;  %139 = vst.msk [vmem:[#allocation4] sm:$0xff] %vm92_vm1, %v482_v1  ;;  %140 = vst.msk [vmem:[#allocation4 + $0x8] sm:$0xff] %vm92_vm1, %v482_v1 }
   0x2   :  { %402 = vmatpush3.bf16.msra.mxu1 %v440_v0  ;;  %405 = vmatprep.mubr.msk.bf16.mxu1 %vm483_vm0, %v482_v1  ;;  %v380_v3 = vld [vmem:[%s606_s0] sm:$0xff]   ;;  %v445_v13 = vld [vmem:[%s612_s6 + $0x30] sm:$0xff]   ;;  %v446_v18 = vld [vmem:[%s612_s6 + $0x28] sm:$0xff]  }
   0x3   :  { %v384_v4 = vld [vmem:[%s607_s1] sm:$0xff]   ;;  %403 = vmatprep.subr.bf16.mxu1 %v482_v1  ;;  %v381_v5 = vunpack.c.l.bf16 %v380_v3  ;;  %v382_v6 = vunpack.c.h.bf16 %v380_v3  ;;  %431 = vmatprep.mubr.msk.bf16.mxu0 %vm483_vm0, %v482_v1  ;;  %v442_v19 = vld [vmem:[%s611_s5 + $0x8] sm:$0xff]  }
   0x4   :  { %v385_v7 = vunpack.c.l.bf16 %v384_v4  ;;  %v386_v8 = vunpack.c.h.bf16 %v384_v4  ;;  %v358_v9 = vld [vmem:[%s608_s2] ss:$0 sm:$0xff]  ;;  %418 = vmatpush3.bf16.msra.mxu0 %v445_v13 }
   0x5   :  { %v359_v10 = vld [vmem:[%s609_s3] ss:$0 sm:$0xff]  ;;  %419 = vmatprep.subr.bf16.mxu0 %v482_v1 }
   0x6   :  { %v40_v11 = vsub.f32 %v385_v7, %v381_v5  ;;  %v41_v12 = vsub.f32 %v386_v8, %v382_v6  ;;  %404 = vmatpush3.bf16.msra.mxu1 %v441_v2 }
   0x7   :  { %409 = vmatprep.subr.bf16.mxu1 %v482_v1 }
   0x8   :  { %v49_v14 = vmul.f32 %v358_v9, %v40_v11  ;;  %v50_v15 = vmul.f32 %v358_v9, %v41_v12  ;;  %v60_v16 = vmul.f32 %v359_v10, %v40_v11  ;;  %v61_v17 = vmul.f32 %v359_v10, %v41_v12 }
   0xa   :  { %v51_v20 = vadd.f32 %v381_v5, %v49_v14  ;;  %v52_v21 = vadd.f32 %v382_v6, %v50_v15  ;;  %v62_v22 = vadd.f32 %v381_v5, %v60_v16  ;;  %v63_v23 = vadd.f32 %v382_v6, %v61_v17 }
   0xb   :  { %12 = vsyncpa [#allocation6], 0  ;;  %420 = vmatpush3.bf16.msra.mxu0 %v446_v18  ;;  %v443_v27 = vld [vmem:[%s611_s5] sm:$0xff]   ;;  %v448_v30 = vld [vmem:[%s612_s6 + $0x18] sm:$0xff]   ;;  %vm272_vm3 = vcmask 916480  }
   0xc   :  { %v377_v24 = vpack.c.bf16 %v51_v20, %v51_v20  ;;  %v378_v25 = vpack.c.bf16 %v52_v21, %v52_v21  ;;  %v75_v26 = vpack.c.bf16 %v63_v23, %v62_v22  ;;  %421 = vmatprep.subr.bf16.mxu0 %v482_v1  ;;  %v447_v29 = vld [vmem:[%s612_s6 + $0x20] sm:$0xff]   ;;  %v449_v31 = vld [vmem:[%s612_s6 + $0x10] sm:$0xff]   ;;  %v450_v32 = vld [vmem:[%s612_s6 + $0x8] sm:$0xff]  }
   0xd   :  { %v451_v33 = vld [vmem:[%s612_s6] sm:$0xff]   ;;  %v213_v57 = vld [vmem:[#allocation4] sm:$0xff]  ;;  %s484_s6 = smov [#allocation5]  }
   0xe   :  { %73 = vst.msk [vmem:[#allocation2] sm:$0xf] %vm72_vm2, %v377_v24  ;;  %74 = vst.msk [vmem:[#allocation2 + $0x4] sm:$0xf] %vm72_vm2, %v378_v25  ;;  %406 = vmatmul.mubr.msk.bf16.vlgmr.msra.gmra.mxu1 %vm92_vm1, %v75_v26  ;;  %v214_v61 = vld [vmem:[#allocation4 + $0x8] sm:$0xff]  ;;  %s347_s25 = sshll.u32 %s484_s6, 4  ;;  %s348_s25 = int_to_ptr.vmem [resolvable:$true] %s347_s25 }
   0xf   :  { %410 = vmatpush3.bf16.msra.mxu1 %v442_v19  ;;  %413 = vmatprep.mubr.msk.bf16.mxu1 %vm483_vm0, %v482_v1  ;;  %s460_s26 = scalar_lea.vmem %s348_s25, 256  ;;  %p465_p1 = scmp.lt.s32.totalorder %s348_s25, %s348_s25 }
  0x10   :  { %411 = vmatprep.subr.bf16.mxu1 %v482_v1  ;;  %422 = vmatpush3.bf16.msra.mxu0 %v447_v29  ;;  %p461_p0 = scmp.ne.s32.totalorder %s348_s25, %s460_s26  ;;  %p466_p2 = scmp.lt.s32.totalorder %s460_s26, %s460_s26 }
  0x11   :  { %423 = vmatprep.subr.bf16.mxu0 %v482_v1 }
  0x12   :  { %p467_p3 = por %p466_p2, %p465_p1 }
  0x13   :  { %412 = vmatpush3.bf16.msra.mxu1 %v443_v27 }
  0x14   :  { %424 = vmatpush3.bf16.msra.mxu0 %v448_v30  ;;  %p468_p4 = pnand %p467_p3, %p461_p0 }
  0x15   :  { %v444_v28 = vld [vmem:[#allocation2] sm:$0xff]   ;;  %425 = vmatprep.subr.bf16.mxu0 %v482_v1 }
  0x16   :  { %414 = vmatmul.mubr.msk.bf16.vlgmr.msra.gmra.mxu1 %vm92_vm1, %v444_v28 }
  0x18   :  { %426 = vmatpush3.bf16.msra.mxu0 %v449_v31 }
  0x19   :  { %427 = vmatprep.subr.bf16.mxu0 %v482_v1 }
  0x1c   :  { %428 = vmatpush3.bf16.msra.mxu0 %v450_v32 }
  0x1d   :  { %429 = vmatprep.subr.bf16.mxu0 %v482_v1 }
  0x20   :  { %430 = vmatpush3.bf16.msra.mxu0 %v451_v33 }
  0xce   :  { %v130_v34 = vpop.f32.mrf.mxu1 }
  0xcf   :  { %137 = vst.msk [vmem:[#allocation3] sm:$0xff] %vm92_vm1, %v130_v34 }
  0xd0   :  { %v407_v35 = vpop.f32.mrf.mxu1 }
  0xd2   :  { %v133_v36 = vpop.f32.mrf.mxu1 }
  0xd3   :  { %138 = vst.msk [vmem:[#allocation3 + $0x8] sm:$0xff] %vm92_vm1, %v133_v36 }
  0xd4   :  { %v408_v37 = vpop.f32.mrf.mxu1 }
  0xd6   :  { %v202_v38 = vpop.f32.mrf.mxu1  ;;  %v324_v47 = vld [vmem:[#allocation3] sm:$0xff] }
  0xd7   :  { %v209_v40 = vmax.f32 %v202_v38, 0.0  ;;  %v326_v48 = vsub.f32 0.0, %v324_v47 }
  0xd8   :  { %v415_v39 = vpop.f32.mrf.mxu1 }
  0xd9   :  { %v211_v44 = vmul.f32 %v209_v40, %v209_v40  ;;  %v328_v51 = vmul.f32 1.442695, %v326_v48 }
  0xda   :  { %v205_v41 = vpop.f32.mrf.mxu1  ;;  %v325_v49 = vld [vmem:[#allocation3 + $0x8] sm:$0xff] }
  0xdb   :  { %v210_v42 = vmax.f32 %v205_v41, 0.0  ;;  %v327_v50 = vsub.f32 0.0, %v325_v49  ;;  %452 = vpow2.f32 %v328_v51 }
  0xdc   :  { %v416_v43 = vpop.f32.mrf.mxu1 }
  0xdd   :  { %v212_v45 = vmul.f32 %v210_v42, %v210_v42  ;;  %v330_v52 = vmul.f32 1.442695, %v327_v50 }
  0xdf   :  { %v215_v46 = vpack.c.bf16 %v212_v45, %v211_v44  ;;  %454 = vpow2.f32 %v330_v52 }
  0xe1   :  { %432 = vmatmul.mubr.msk.bf16.vlgmr.msra.gmra.mxu0 %vm272_vm3, %v215_v46 }
  0xe8   :  { %v453_v53 = vpop.eup %452 }
  0xe9   :  { %v332_v54 = vadd.f32 1.0, %v453_v53 }
  0xeb   :  { %456 = vrcp.f32 %v332_v54 }
  0xec   :  { %v455_v55 = vpop.eup %454 }
  0xed   :  { %v333_v56 = vadd.f32 1.0, %v455_v55 }
  0xef   :  { %458 = vrcp.f32 %v333_v56 }
  0xf8   :  { %v457_v1 = vpop.eup %456 }
  0xfc   :  { %v459_v4 = vpop.eup %458 }
 0x1a1   :  { %v310_v58 = vpop.f32.mrf.mxu0 }
 0x1a2   :  { %v317_v59 = vadd.f32 %v310_v58, %v213_v57 }
 0x1a3   :  { %v433_v60 = vpop.f32.mrf.mxu0 }
 0x1a4   :  { %319 = vst.msk [vmem:[#allocation4] sm:$0xff] %vm92_vm1, %v317_v59 }
 0x1a5   :  { %v313_v62 = vpop.f32.mrf.mxu0 }
 0x1a6   :  { %v318_v63 = vadd.f32 %v313_v62, %v214_v61 }
 0x1a7   :  { %v434_v0 = vpop.f32.mrf.mxu0 }
 0x1a8   :  { %320 = vst.msk [vmem:[#allocation4 + $0x8] sm:$0xff] %vm92_vm1, %v318_v63 }
 0x1ab   :  { %v336_v2 = vld [vmem:[#allocation4] sm:$0xff] }
 0x1ac   :  { %v338_v3 = vmul.f32 %v457_v1, %v336_v2 }
 0x1ae   :  { %340 = vst.msk [vmem:[#allocation5] sm:$0xff] %vm92_vm1, %v338_v3 }
 0x1af   :  { %v337_v5 = vld [vmem:[#allocation4 + $0x8] sm:$0xff] }
 0x1b0   :  { %v339_v6 = vmul.f32 %v459_v4, %v337_v5 }
 0x1b2   :  { %341 = vst.msk [vmem:[#allocation5 + $0x8] sm:$0xff] %vm92_vm1, %v339_v6 }
 0x1b3   :  { %471 = shalt.err (!%p468_p4)
}
 0x1b4   :  { %s485_s27 = smov 128   ;;  %s486_s28 = smov 8  }
 0x1b5   :  { %353 = dma.vmem_to_hbm [thread:$0]  %s348_s25, 256, %s613_s7, [#allocation6], %s485_s27, %s485_s27, %s486_s28  }
 0x1b6   :  { %480 = dma.done.wait [#allocation6], 256  }
 0x1b7   :  { %481 = vsyncadd [#allocation6], 4294967040 }
 0x1b8   :  { %357 = vsyncpa [#allocation6], 1 }

</bundles_post_ra>
